<compile_context>
chip_gen: v5e
topology: v5e:2x2
jax: 0.10.0
libtpu: 0.0.40
codegen_flags: <defaults>
</compile_context>

<pallas_src>
import functools

import jax
import jax.numpy as jnp
from jax import lax
from jax.experimental import pallas as pl
from jax.experimental.pallas import tpu as pltpu


def _round_up(a, b):
    return (a + b - 1) // b * b


# -----------------------------------------------------------------------------
# Fused kernel: one (batch, M-tile) grid step does kNN + interpolate + MLP.
# -----------------------------------------------------------------------------
def _fused_fp_kernel(*refs, n_layers, has_y, k, idx_mask):
    it = iter(refs)
    p_ref = next(it)        # (1, N, 3)   reference point coordinates
    psq_ref = next(it)      # (1, N, 1)   |p|^2
    qT_ref = next(it)       # (1, 3, tm)  query coordinates, lane-dense in M
    qsq_ref = next(it)      # (1, 1, tm)  |q|^2
    x_ref = next(it)        # (1, Cx, N)  features on the reference points
    y_ref = next(it) if has_y else None   # (1, Cy, tm) skip features
    layer_refs = []
    for li in range(n_layers):
        if li == 0 and has_y:
            layer_refs.append((next(it), next(it), next(it)))   # (Wx, Wy, b)
        else:
            layer_refs.append((next(it), next(it)))             # (W, b)
    o_ref = next(it)        # (1, C_out, tm)

    p = p_ref[0]
    p_sq = psq_ref[0]
    qT = qT_ref[0]
    q_sq = qsq_ref[0]
    feats = x_ref[0]
    N = p.shape[0]
    tm = qT.shape[1]

    # ---- pairwise squared distances on the MXU: |p|^2 + |q|^2 - 2 p.q, clamped at 0.
    qp = jnp.dot(p, qT, preferred_element_type=jnp.float32)          # (N, tm)
    dist = jnp.maximum(p_sq + q_sq - 2.0 * qp, 0.0)                  # (N, tm)

    # ---- gather-free kNN: packed-key argmin (index packed into low mantissa bits of
    #      the non-negative f32 distance) -> one min-reduction per neighbour.
    #      Ties / near-ties (within idx_mask ulps) break to the lowest reference index.
    row = lax.broadcasted_iota(jnp.int32, (N, tm), 0)
    packed_bits = jnp.bitwise_or(
        jnp.bitwise_and(pltpu.bitcast(jnp.abs(dist), jnp.int32), jnp.int32(~idx_mask)),
        row)
    work = pltpu.bitcast(packed_bits, jnp.float32)   # finite non-negative, same ordering
    sel = jnp.zeros((N, tm), jnp.float32)
    for _ in range(k):                               # k is tiny & static -> unrolled
        kmin = jnp.min(work, axis=0, keepdims=True)                          # (1, tm)
        idx = jnp.bitwise_and(pltpu.bitcast(kmin, jnp.int32), jnp.int32(idx_mask))
        onehot = row == idx                                                   # (N, tm)
        sel = sel + onehot.astype(jnp.float32)
        work = jnp.where(onehot, jnp.float32(jnp.inf), work)

    # ---- inverse-distance weights on the EXACT distances, normalized per query.
    w = sel * (1.0 / jnp.maximum(dist, 1e-10))
    w = w / jnp.sum(w, axis=0, keepdims=True)

    # ---- interpolation: (Cx, N) @ (N, tm) -> (Cx, tm). Native MXU layout,
    #      output lane-dense in M (no transposes anywhere).
    h = jnp.dot(feats, w, preferred_element_type=jnp.float32)

    # ---- fused MLP: 1x1 conv + folded BatchNorm + ReLU. Concat folded into layer 0.
    if n_layers == 0:
        if has_y:
            h = jnp.concatenate([h, y_ref[0]], axis=0)
        o_ref[0] = h
        return

    for li, prm in enumerate(layer_refs):
        if li == 0 and has_y:
            wx_ref, wy_ref, b_ref = prm
            a = (jnp.dot(wx_ref[...], h, preferred_element_type=jnp.float32)
                 + jnp.dot(wy_ref[...], y_ref[0], preferred_element_type=jnp.float32)
                 + b_ref[...])
        else:
            w_ref, b_ref = prm
            a = jnp.dot(w_ref[...], h, preferred_element_type=jnp.float32) + b_ref[...]
        h = jnp.maximum(a, 0.0)

    o_ref[0] = h


# -----------------------------------------------------------------------------
# Module wrapper (parameters init matches nn.Conv1d / fresh nn.BatchNorm1d shapes).
# -----------------------------------------------------------------------------
class FeaturePropagation:
    def __init__(self, in_channels, mlp, k=3, bias=True, key=None):
        if key is None:
            key = jax.random.PRNGKey(0)
        self.k = k
        self.in_channels = in_channels
        self.params = []
        last = in_channels
        for ch in mlp:
            key, k_w, k_b = jax.random.split(key, 3)
            bound = 1.0 / (last ** 0.5)              # PyTorch Conv1d default init
            w = jax.random.uniform(k_w, (ch, last), jnp.float32, -bound, bound)
            b = (jax.random.uniform(k_b, (ch,), jnp.float32, -bound, bound)
                 if bias else jnp.zeros((ch,), jnp.float32))
            # BatchNorm1d (eval mode, fresh stats) folded into the 1x1 conv.
            gamma = jnp.ones((ch,), jnp.float32)
            beta = jnp.zeros((ch,), jnp.float32)
            mean = jnp.zeros((ch,), jnp.float32)
            var = jnp.ones((ch,), jnp.float32)
            eps = 1e-5
            scale = gamma / jnp.sqrt(var + eps)
            w_f = w * scale[:, None]
            b_f = (scale * (b - mean) + beta)[:, None]
            self.params.append((w_f, b_f))
            last = ch

    def __call__(self, p, q, x, y=None, block_m=128):
        B, N, _ = p.shape
        M = q.shape[1]
        Cx = x.shape[1]
        has_y = y is not None
        Cy = y.shape[1] if has_y else 0
        n_layers = len(self.params)
        assert 1 <= self.k <= N, "need 1 <= k <= number of reference points"
        if n_layers:
            assert self.params[0][0].shape[1] == Cx + Cy, "in_channels must equal Cx+Cy"

        # ---- wrapper-side layout glue (pure JAX, O(B*(N+M)) work) ----
        tm = block_m
        if M < tm:
            tm = _round_up(M, 8)          # single tile, block == full padded dim
        M_pad = _round_up(M, tm)
        pad_m = M_pad - M

        p32 = p.astype(jnp.float32)
        p_sq = jnp.sum(p32 * p32, axis=2, keepdims=True)              # (B, N, 1)
        qT = jnp.transpose(q, (0, 2, 1)).astype(jnp.float32)          # (B, 3, M)
        if pad_m:
            qT = jnp.pad(qT, ((0, 0), (0, 0), (0, pad_m)))
        q_sq = jnp.sum(qT * qT, axis=1, keepdims=True)                # (B, 1, M_pad)
        x32 = x.astype(jnp.float32)

        inputs = [p32, p_sq, qT, q_sq, x32]
        in_specs = [
            pl.BlockSpec((1, N, 3), lambda b, m: (b, 0, 0)),
            pl.BlockSpec((1, N, 1), lambda b, m: (b, 0, 0)),
            pl.BlockSpec((1, 3, tm), lambda b, m: (b, 0, m)),
            pl.BlockSpec((1, 1, tm), lambda b, m: (b, 0, m)),
            pl.BlockSpec((1, Cx, N), lambda b, m: (b, 0, 0)),
        ]
        if has_y:
            y32 = y.astype(jnp.float32)
            if pad_m:
                y32 = jnp.pad(y32, ((0, 0), (0, 0), (0, pad_m)))
            inputs.append(y32)
            in_specs.append(pl.BlockSpec((1, Cy, tm), lambda b, m: (b, 0, m)))

        # Fold the channel concat into the first layer: W1 = [W1x | W1y].
        if n_layers:
            w1, b1 = self.params[0]
            flat = ([w1[:, :Cx], w1[:, Cx:], b1] if has_y else [w1, b1])
            for w_i, b_i in self.params[1:]:
                flat += [w_i, b_i]
            c_out = self.params[-1][0].shape[0]
        else:
            flat = []
            c_out = Cx + Cy
        for arr in flat:   # weights resident in VMEM (constant block index -> DMA'd once)
            inputs.append(arr)
            in_specs.append(pl.BlockSpec(arr.shape, lambda b, m: (0, 0)))

        idx_bits = max(1, (N - 1).bit_length())
        kernel = functools.partial(
            _fused_fp_kernel, n_layers=n_layers, has_y=has_y, k=self.k,
            idx_mask=(1 << idx_bits) - 1)

        out = pl.pallas_call(
            kernel,
            out_shape=jax.ShapeDtypeStruct((B, c_out, M_pad), jnp.float32),
            grid=(B, M_pad // tm),
            in_specs=in_specs,
            out_specs=pl.BlockSpec((1, c_out, tm), lambda b, m: (b, 0, m)),
            compiler_params=pltpu.CompilerParams(
                dimension_semantics=("parallel", "parallel"),
                vmem_limit_bytes=32 * 1024 * 1024),
        )(*inputs)

        if pad_m:
            out = out[:, :, :M]
        return q, out


# -----------------------------------------------------------------------------
# Pure-JAX reference (brute-force kNN + interpolation + MLP) for validation.
# -----------------------------------------------------------------------------
def _reference_forward(p, q, x, y, params, k):
    d = jnp.sum((q[:, :, None, :] - p[:, None, :, :]) ** 2, axis=-1)       # (B, M, N)
    neg_topk, idx = lax.top_k(-d, k)                                        # (B, M, k)
    sqd = jnp.maximum(-neg_topk, 1e-10)
    w = 1.0 / sqd
    w = w / jnp.sum(w, axis=-1, keepdims=True)
    onehot = jax.nn.one_hot(idx, p.shape[1], dtype=jnp.float32)             # (B, M, k, N)
    wmat = jnp.sum(onehot * w[..., None], axis=2)                           # (B, M, N)
    h = jnp.einsum("bcn,bmn->bcm", x, wmat, precision=lax.Precision.HIGHEST)
    if y is not None:
        h = jnp.concatenate([h, y], axis=1)
    for w_f, b_f in params:
        h = jnp.maximum(
            jnp.einsum("oi,bim->bom", w_f, h, precision=lax.Precision.HIGHEST)
            + b_f[None, :, :], 0.0)
    return h


if __name__ == "__main__":
    key = jax.random.PRNGKey(0)
    kp, kq, kx, ky, kw = jax.random.split(key, 5)

    B = 2          # batch
    N = 8          # sparse (reference) points carrying features x
    M = 16         # dense (query) points carrying skip features y
    Cx, Cy = 8, 8  # feature channels

    p = jax.random.normal(kp, (B, N, 3), jnp.float32)
    q = jax.random.normal(kq, (B, M, 3), jnp.float32)
    x = jax.random.normal(kx, (B, Cx, N), jnp.float32)
    y = jax.random.normal(ky, (B, Cy, M), jnp.float32)

    fp = FeaturePropagation(in_channels=Cx + Cy, mlp=[32, 16], k=3, bias=True, key=kw)
    q_out, feat = fp(p, q, x, y)
    jax.block_until_ready(feat)

    assert q_out.shape == (B, M, 3)
    assert feat.shape == (B, 16, M)
    assert bool(jnp.all(jnp.isfinite(feat)))

    ref = _reference_forward(p, q, x, y, fp.params, fp.k)
    assert bool(jnp.allclose(feat, ref, rtol=1e-2, atol=1e-2)), "mismatch vs JAX reference"

    print("KERNEL_OK")
</pallas_src>

<mosaic_0001>
module attributes {stable_mosaic.version = 11 : i64} {
  func.func @_fused_fp_kernel(%arg0: i32, %arg1: i32, %arg2: memref<1x8x3xf32, #tpu.memory_space<vmem>>, %arg3: memref<1x8x1xf32, #tpu.memory_space<vmem>>, %arg4: memref<1x3x16xf32, #tpu.memory_space<vmem>>, %arg5: memref<1x1x16xf32, #tpu.memory_space<vmem>>, %arg6: memref<1x8x8xf32, #tpu.memory_space<vmem>>, %arg7: memref<1x8x16xf32, #tpu.memory_space<vmem>>, %arg8: memref<32x8xf32, #tpu.memory_space<vmem>>, %arg9: memref<32x8xf32, #tpu.memory_space<vmem>>, %arg10: memref<32x1xf32, #tpu.memory_space<vmem>>, %arg11: memref<16x32xf32, #tpu.memory_space<vmem>>, %arg12: memref<16x1xf32, #tpu.memory_space<vmem>>, %arg13: memref<1x16x16xf32, #tpu.memory_space<vmem>>) attributes {dimension_semantics = [#tpu.dimension_semantics<parallel>, #tpu.dimension_semantics<parallel>], iteration_bounds = array<i64: 2, 1>, scalar_prefetch = 0 : i64, scratch_operands = 0 : i64, tpu.core_type = #tpu.core_type<tc>, window_params = [{transform_indices = @transform_0, window_bounds = array<i64: 1, 8, 3>}, {transform_indices = @transform_1, window_bounds = array<i64: 1, 8, 1>}, {transform_indices = @transform_2, window_bounds = array<i64: 1, 3, 16>}, {transform_indices = @transform_3, window_bounds = array<i64: 1, 1, 16>}, {transform_indices = @transform_4, window_bounds = array<i64: 1, 8, 8>}, {transform_indices = @transform_5, window_bounds = array<i64: 1, 8, 16>}, {pipeline_mode = #tpu.pipeline_mode<synchronous>, transform_indices = @transform_6, window_bounds = array<i64: 32, 8>}, {pipeline_mode = #tpu.pipeline_mode<synchronous>, transform_indices = @transform_7, window_bounds = array<i64: 32, 8>}, {pipeline_mode = #tpu.pipeline_mode<synchronous>, transform_indices = @transform_8, window_bounds = array<i64: 32, 1>}, {pipeline_mode = #tpu.pipeline_mode<synchronous>, transform_indices = @transform_9, window_bounds = array<i64: 16, 32>}, {pipeline_mode = #tpu.pipeline_mode<synchronous>, transform_indices = @transform_10, window_bounds = array<i64: 16, 1>}, {transform_indices = @transform_11, window_bounds = array<i64: 1, 16, 16>}]} {
    %c0 = arith.constant 0 : index
    %c0_0 = arith.constant 0 : index
    %c0_1 = arith.constant 0 : index
    %0 = vector.load %arg2[%c0, %c0_0, %c0_1] : memref<1x8x3xf32, #tpu.memory_space<vmem>>, vector<1x8x3xf32>
    %1 = vector.shape_cast %0 : vector<1x8x3xf32> to vector<8x3xf32>
    %c0_2 = arith.constant 0 : index
    %c0_3 = arith.constant 0 : index
    %c0_4 = arith.constant 0 : index
    %2 = vector.load %arg3[%c0_2, %c0_3, %c0_4] : memref<1x8x1xf32, #tpu.memory_space<vmem>>, vector<1x8x1xf32>
    %3 = vector.shape_cast %2 : vector<1x8x1xf32> to vector<8x1xf32>
    %c0_5 = arith.constant 0 : index
    %c0_6 = arith.constant 0 : index
    %c0_7 = arith.constant 0 : index
    %4 = vector.load %arg4[%c0_5, %c0_6, %c0_7] : memref<1x3x16xf32, #tpu.memory_space<vmem>>, vector<1x3x16xf32>
    %5 = vector.shape_cast %4 : vector<1x3x16xf32> to vector<3x16xf32>
    %c0_8 = arith.constant 0 : index
    %c0_9 = arith.constant 0 : index
    %c0_10 = arith.constant 0 : index
    %6 = vector.load %arg5[%c0_8, %c0_9, %c0_10] : memref<1x1x16xf32, #tpu.memory_space<vmem>>, vector<1x1x16xf32>
    %7 = vector.shape_cast %6 : vector<1x1x16xf32> to vector<1x16xf32>
    %c0_11 = arith.constant 0 : index
    %c0_12 = arith.constant 0 : index
    %c0_13 = arith.constant 0 : index
    %8 = vector.load %arg6[%c0_11, %c0_12, %c0_13] : memref<1x8x8xf32, #tpu.memory_space<vmem>>, vector<1x8x8xf32>
    %9 = vector.shape_cast %8 : vector<1x8x8xf32> to vector<8x8xf32>
    %cst = arith.constant dense<0.000000e+00> : vector<8x16xf32>
    %10 = tpu.matmul %1, %5, %cst {dimension_numbers = #tpu.dot_dimension_numbers<[1], [0], [0], [1], [0, 0, 1, 1], [], []>} : vector<8x3xf32>, vector<3x16xf32>, vector<8x16xf32> -> vector<8x16xf32>
    %11 = vector.broadcast %3 : vector<8x1xf32> to vector<8x16xf32>
    %12 = vector.broadcast %7 : vector<1x16xf32> to vector<8x16xf32>
    %13 = arith.addf %11, %12 : vector<8x16xf32>
    %cst_14 = arith.constant 2.000000e+00 : f32
    %14 = vector.broadcast %cst_14 : f32 to vector<8x16xf32>
    %15 = arith.mulf %14, %10 : vector<8x16xf32>
    %16 = arith.subf %13, %15 : vector<8x16xf32>
    %cst_15 = arith.constant 0.000000e+00 : f32
    %17 = vector.broadcast %cst_15 : f32 to vector<8x16xf32>
    %18 = arith.maximumf %16, %17 : vector<8x16xf32>
    %19 = tpu.iota {dimensions = array<i32: 0>} : vector<8x16xi32>
    %20 = math.absf %18 : vector<8x16xf32>
    %21 = tpu.bitcast %20 : vector<8x16xf32> -> vector<8x16xi32>
    %c-8_i32 = arith.constant -8 : i32
    %22 = vector.broadcast %c-8_i32 : i32 to vector<8x16xi32>
    %23 = arith.andi %21, %22 : vector<8x16xi32>
    %24 = arith.ori %23, %19 : vector<8x16xi32>
    %25 = tpu.bitcast %24 : vector<8x16xi32> -> vector<8x16xf32>
    %cst_16 = arith.constant 0.000000e+00 : f32
    %26 = vector.broadcast %cst_16 : f32 to vector<8x16xf32>
    %cst_17 = arith.constant dense<0x7F800000> : vector<16xf32>
    %27 = vector.multi_reduction <minimumf>, %25, %cst_17 [0] : vector<8x16xf32> to vector<16xf32>
    %28 = vector.shape_cast %27 : vector<16xf32> to vector<1x16xf32>
    %29 = tpu.bitcast %28 : vector<1x16xf32> -> vector<1x16xi32>
    %c7_i32 = arith.constant 7 : i32
    %30 = vector.broadcast %c7_i32 : i32 to vector<1x16xi32>
    %31 = arith.andi %29, %30 : vector<1x16xi32>
    %32 = vector.broadcast %31 : vector<1x16xi32> to vector<8x16xi32>
    %33 = arith.cmpi eq, %19, %32 : vector<8x16xi32>
    %34 = arith.extui %33 : vector<8x16xi1> to vector<8x16xi32>
    %35 = arith.sitofp %34 : vector<8x16xi32> to vector<8x16xf32>
    %36 = arith.addf %26, %35 : vector<8x16xf32>
    %cst_18 = arith.constant 0x7F800000 : f32
    %37 = vector.broadcast %cst_18 : f32 to vector<8x16xf32>
    %38 = arith.select %33, %37, %25 : vector<8x16xi1>, vector<8x16xf32>
    %cst_19 = arith.constant dense<0x7F800000> : vector<16xf32>
    %39 = vector.multi_reduction <minimumf>, %38, %cst_19 [0] : vector<8x16xf32> to vector<16xf32>
    %40 = vector.shape_cast %39 : vector<16xf32> to vector<1x16xf32>
    %41 = tpu.bitcast %40 : vector<1x16xf32> -> vector<1x16xi32>
    %c7_i32_20 = arith.constant 7 : i32
    %42 = vector.broadcast %c7_i32_20 : i32 to vector<1x16xi32>
    %43 = arith.andi %41, %42 : vector<1x16xi32>
    %44 = vector.broadcast %43 : vector<1x16xi32> to vector<8x16xi32>
    %45 = arith.cmpi eq, %19, %44 : vector<8x16xi32>
    %46 = arith.extui %45 : vector<8x16xi1> to vector<8x16xi32>
    %47 = arith.sitofp %46 : vector<8x16xi32> to vector<8x16xf32>
    %48 = arith.addf %36, %47 : vector<8x16xf32>
    %cst_21 = arith.constant 0x7F800000 : f32
    %49 = vector.broadcast %cst_21 : f32 to vector<8x16xf32>
    %50 = arith.select %45, %49, %38 : vector<8x16xi1>, vector<8x16xf32>
    %cst_22 = arith.constant dense<0x7F800000> : vector<16xf32>
    %51 = vector.multi_reduction <minimumf>, %50, %cst_22 [0] : vector<8x16xf32> to vector<16xf32>
    %52 = vector.shape_cast %51 : vector<16xf32> to vector<1x16xf32>
    %53 = tpu.bitcast %52 : vector<1x16xf32> -> vector<1x16xi32>
    %c7_i32_23 = arith.constant 7 : i32
    %54 = vector.broadcast %c7_i32_23 : i32 to vector<1x16xi32>
    %55 = arith.andi %53, %54 : vector<1x16xi32>
    %56 = vector.broadcast %55 : vector<1x16xi32> to vector<8x16xi32>
    %57 = arith.cmpi eq, %19, %56 : vector<8x16xi32>
    %58 = arith.extui %57 : vector<8x16xi1> to vector<8x16xi32>
    %59 = arith.sitofp %58 : vector<8x16xi32> to vector<8x16xf32>
    %60 = arith.addf %48, %59 : vector<8x16xf32>
    %cst_24 = arith.constant 1.000000e-10 : f32
    %61 = vector.broadcast %cst_24 : f32 to vector<8x16xf32>
    %62 = arith.maximumf %18, %61 : vector<8x16xf32>
    %cst_25 = arith.constant 1.000000e+00 : f32
    %63 = vector.broadcast %cst_25 : f32 to vector<8x16xf32>
    %64 = arith.divf %63, %62 : vector<8x16xf32>
    %65 = arith.mulf %60, %64 : vector<8x16xf32>
    %cst_26 = arith.constant dense<0.000000e+00> : vector<16xf32>
    %66 = vector.multi_reduction <add>, %65, %cst_26 [0] : vector<8x16xf32> to vector<16xf32>
    %67 = vector.shape_cast %66 : vector<16xf32> to vector<1x16xf32>
    %68 = vector.broadcast %67 : vector<1x16xf32> to vector<8x16xf32>
    %69 = arith.divf %65, %68 : vector<8x16xf32>
    %cst_27 = arith.constant dense<0.000000e+00> : vector<8x16xf32>
    %70 = tpu.matmul %9, %69, %cst_27 {dimension_numbers = #tpu.dot_dimension_numbers<[1], [0], [0], [1], [0, 0, 1, 1], [], []>} : vector<8x8xf32>, vector<8x16xf32>, vector<8x16xf32> -> vector<8x16xf32>
    %c0_28 = arith.constant 0 : index
    %c0_29 = arith.constant 0 : index
    %71 = vector.load %arg8[%c0_28, %c0_29] : memref<32x8xf32, #tpu.memory_space<vmem>>, vector<32x8xf32>
    %cst_30 = arith.constant dense<0.000000e+00> : vector<32x16xf32>
    %72 = tpu.matmul %71, %70, %cst_30 {dimension_numbers = #tpu.dot_dimension_numbers<[1], [0], [0], [1], [0, 0, 1, 1], [], []>} : vector<32x8xf32>, vector<8x16xf32>, vector<32x16xf32> -> vector<32x16xf32>
    %c0_31 = arith.constant 0 : index
    %c0_32 = arith.constant 0 : index
    %73 = vector.load %arg9[%c0_31, %c0_32] : memref<32x8xf32, #tpu.memory_space<vmem>>, vector<32x8xf32>
    %c0_33 = arith.constant 0 : index
    %c0_34 = arith.constant 0 : index
    %c0_35 = arith.constant 0 : index
    %74 = vector.load %arg7[%c0_33, %c0_34, %c0_35] : memref<1x8x16xf32, #tpu.memory_space<vmem>>, vector<1x8x16xf32>
    %75 = vector.shape_cast %74 : vector<1x8x16xf32> to vector<8x16xf32>
    %cst_36 = arith.constant dense<0.000000e+00> : vector<32x16xf32>
    %76 = tpu.matmul %73, %75, %cst_36 {dimension_numbers = #tpu.dot_dimension_numbers<[1], [0], [0], [1], [0, 0, 1, 1], [], []>} : vector<32x8xf32>, vector<8x16xf32>, vector<32x16xf32> -> vector<32x16xf32>
    %77 = arith.addf %72, %76 : vector<32x16xf32>
    %c0_37 = arith.constant 0 : index
    %c0_38 = arith.constant 0 : index
    %78 = vector.load %arg10[%c0_37, %c0_38] : memref<32x1xf32, #tpu.memory_space<vmem>>, vector<32x1xf32>
    %79 = vector.broadcast %78 : vector<32x1xf32> to vector<32x16xf32>
    %80 = arith.addf %77, %79 : vector<32x16xf32>
    %cst_39 = arith.constant 0.000000e+00 : f32
    %81 = vector.broadcast %cst_39 : f32 to vector<32x16xf32>
    %82 = arith.maximumf %80, %81 : vector<32x16xf32>
    %c0_40 = arith.constant 0 : index
    %c0_41 = arith.constant 0 : index
    %83 = vector.load %arg11[%c0_40, %c0_41] : memref<16x32xf32, #tpu.memory_space<vmem>>, vector<16x32xf32>
    %cst_42 = arith.constant dense<0.000000e+00> : vector<16x16xf32>
    %84 = tpu.matmul %83, %82, %cst_42 {dimension_numbers = #tpu.dot_dimension_numbers<[1], [0], [0], [1], [0, 0, 1, 1], [], []>} : vector<16x32xf32>, vector<32x16xf32>, vector<16x16xf32> -> vector<16x16xf32>
    %c0_43 = arith.constant 0 : index
    %c0_44 = arith.constant 0 : index
    %85 = vector.load %arg12[%c0_43, %c0_44] : memref<16x1xf32, #tpu.memory_space<vmem>>, vector<16x1xf32>
    %86 = vector.broadcast %85 : vector<16x1xf32> to vector<16x16xf32>
    %87 = arith.addf %84, %86 : vector<16x16xf32>
    %cst_45 = arith.constant 0.000000e+00 : f32
    %88 = vector.broadcast %cst_45 : f32 to vector<16x16xf32>
    %89 = arith.maximumf %87, %88 : vector<16x16xf32>
    %c0_46 = arith.constant 0 : index
    %c0_47 = arith.constant 0 : index
    %c0_48 = arith.constant 0 : index
    %90 = vector.load %arg13[%c0_46, %c0_47, %c0_48] : memref<1x16x16xf32, #tpu.memory_space<vmem>>, vector<1x16x16xf32>
    %91 = vector.shape_cast %90 : vector<1x16x16xf32> to vector<16x16xf32>
    %92 = vector.shape_cast %89 : vector<16x16xf32> to vector<1x16x16xf32>
    tpu.vector_store %arg13[%c0_46, %c0_47, %c0_48], %92 {strides = array<i32>} : memref<1x16x16xf32, #tpu.memory_space<vmem>>, vector<1x16x16xf32>,
    return
  }
  func.func @transform_0(%arg0: i32, %arg1: i32) -> (i32, i32, i32) {
    %c0_i32 = arith.constant 0 : i32
    %c0_i32_0 = arith.constant 0 : i32
    %c0_i32_1 = arith.constant 0 : i32
    return %arg0, %c0_i32, %c0_i32_0 : i32, i32, i32
  }
  func.func @transform_1(%arg0: i32, %arg1: i32) -> (i32, i32, i32) {
    %c0_i32 = arith.constant 0 : i32
    %c0_i32_0 = arith.constant 0 : i32
    %c0_i32_1 = arith.constant 0 : i32
    return %arg0, %c0_i32, %c0_i32_0 : i32, i32, i32
  }
  func.func @transform_2(%arg0: i32, %arg1: i32) -> (i32, i32, i32) {
    %c0_i32 = arith.constant 0 : i32
    %c0_i32_0 = arith.constant 0 : i32
    return %arg0, %c0_i32, %arg1 : i32, i32, i32
  }
  func.func @transform_3(%arg0: i32, %arg1: i32) -> (i32, i32, i32) {
    %c0_i32 = arith.constant 0 : i32
    %c0_i32_0 = arith.constant 0 : i32
    return %arg0, %c0_i32, %arg1 : i32, i32, i32
  }
  func.func @transform_4(%arg0: i32, %arg1: i32) -> (i32, i32, i32) {
    %c0_i32 = arith.constant 0 : i32
    %c0_i32_0 = arith.constant 0 : i32
    %c0_i32_1 = arith.constant 0 : i32
    return %arg0, %c0_i32, %c0_i32_0 : i32, i32, i32
  }
  func.func @transform_5(%arg0: i32, %arg1: i32) -> (i32, i32, i32) {
    %c0_i32 = arith.constant 0 : i32
    %c0_i32_0 = arith.constant 0 : i32
    return %arg0, %c0_i32, %arg1 : i32, i32, i32
  }
  func.func @transform_6(%arg0: i32, %arg1: i32) -> (i32, i32) {
    %c0_i32 = arith.constant 0 : i32
    %c0_i32_0 = arith.constant 0 : i32
    %c0_i32_1 = arith.constant 0 : i32
    return %c0_i32, %c0_i32_0 : i32, i32
  }
  func.func @transform_7(%arg0: i32, %arg1: i32) -> (i32, i32) {
    %c0_i32 = arith.constant 0 : i32
    %c0_i32_0 = arith.constant 0 : i32
    %c0_i32_1 = arith.constant 0 : i32
    return %c0_i32, %c0_i32_0 : i32, i32
  }
  func.func @transform_8(%arg0: i32, %arg1: i32) -> (i32, i32) {
    %c0_i32 = arith.constant 0 : i32
    %c0_i32_0 = arith.constant 0 : i32
    %c0_i32_1 = arith.constant 0 : i32
    return %c0_i32, %c0_i32_0 : i32, i32
  }
  func.func @transform_9(%arg0: i32, %arg1: i32) -> (i32, i32) {
    %c0_i32 = arith.constant 0 : i32
    %c0_i32_0 = arith.constant 0 : i32
    %c0_i32_1 = arith.constant 0 : i32
    return %c0_i32, %c0_i32_0 : i32, i32
  }
  func.func @transform_10(%arg0: i32, %arg1: i32) -> (i32, i32) {
    %c0_i32 = arith.constant 0 : i32
    %c0_i32_0 = arith.constant 0 : i32
    %c0_i32_1 = arith.constant 0 : i32
    return %c0_i32, %c0_i32_0 : i32, i32
  }
  func.func @transform_11(%arg0: i32, %arg1: i32) -> (i32, i32, i32) {
    %c0_i32 = arith.constant 0 : i32
    %c0_i32_0 = arith.constant 0 : i32
    return %arg0, %c0_i32, %arg1 : i32, i32, i32
  }
}

</mosaic_0001>

<bundles_post_ra>
// kernel: tpu_custom_call.1
= control target key start
LH: loop header
LB: loop body
LE: loop exit
PB: predicated region body
PF: predicated region fallthrough
CT: control target
= control target key end

     0   :  { %16 = vsyncpa [#allocation3], 0  ;;  %s1429_s0 = inlined_call_operand.vmem [shape: f32[2,8,3], index: 0, kind: input, shape index: {}]   ;;  %s1430_s1 = inlined_call_operand.vmem [shape: f32[2,8,1], index: 1, kind: input, shape index: {}]   ;;  %s1431_s2 = inlined_call_operand.vmem [shape: f32[2,3,16], index: 2, kind: input, shape index: {}]   ;;  %s1432_s3 = inlined_call_operand.vmem [shape: f32[2,1,16], index: 3, kind: input, shape index: {}]   ;;  %s1433_s4 = inlined_call_operand.vmem [shape: f32[2,8,8], index: 4, kind: input, shape index: {}]   ;;  %s1434_s5 = inlined_call_operand.vmem [shape: f32[2,8,16], index: 5, kind: input, shape index: {}]   ;;  %s1435_s6 = inlined_call_operand.vmem [shape: f32[32,8], index: 6, kind: input, shape index: {}]   ;;  %s1436_s7 = inlined_call_operand.vmem [shape: f32[32,8], index: 7, kind: input, shape index: {}]   ;;  %s1437_s8 = inlined_call_operand.vmem [shape: f32[32,1], index: 8, kind: input, shape index: {}]   ;;  %s1438_s9 = inlined_call_operand.vmem [shape: f32[16,32], index: 9, kind: input, shape index: {}]   ;;  %s1439_s10 = inlined_call_operand.vmem [shape: f32[16,1], index: 10, kind: input, shape index: {}]   ;;  %s1440_s11 = inlined_call_operand.hbm [shape: f32[2,16,16], index: 11, kind: output, shape index: {}]  }
   0x1   :  { %18 = vsyncpa [#allocation3 + $0x1], 0  ;;  %s1240_s17 = smov 0   ;;  %s1242_s18 = smov 0  }
   0x2   :  { %s1244_s19 = smov 0   ;;  %s1246_s20 = smov 0  }
   0x3   :  { %s1248_s21 = smov 0   ;;  %s1250_s22 = smov 0  }
   0x4 LB: > { %1446 = sst [smem:[#allocation5_spill]] %s1154_s17  ;;  %s994_s23 = sadd.s32 4294967295, %s1174_s22   ;;  %s1174_s22 = sphi %s1250_s22, %s24_s22   ;;  %s1170_s21 = sphi %s1248_s21, %s1461_s21   ;;  %s1166_s20 = sphi %s1246_s20, %s1460_s20   ;;  %s1162_s19 = sphi %s1244_s19, %s1459_s19   ;;  %s1158_s18 = sphi %s1242_s18, %s1463_s18   ;;  %s1154_s17 = sphi %s1240_s17, %s1462_s17  }
   0x5   : > { %1447 = sst [smem:[#allocation6_spill]] %s1162_s19  ;;  %s995_s24 = sadd.s32 4294967294, %s1174_s22  }
   0x6   : > { %1448 = sst [smem:[#allocation7_spill]] %s1170_s21  ;;  %s36_s25 = sadd.s32 1, %s1170_s21 }
   0x7   : > { %s312_s26 = sadd.s32 1, %s1162_s19  ;;  %p38_p0 = scmp.ge.s32.totalorder %s36_s25, 2 }
   0x8   : > { %p322_p1 = scmp.ne.s32.totalorder %s1162_s19, %s1158_s18  ;;  %p323_p2 = scmp.eq.s32.totalorder %s994_s23, 1 }
   0x9   : > { %p328_p3 = scmp.ne.s32.totalorder %s1158_s18, %s1154_s17  ;;  %s1465_s25 = smov (%p38_p0, %s36_s25), 0 }
   0xa   : > { %1449 = sst [smem:[#allocation8_spill]] %s1465_s25  ;;  %p1280_p4 = por %p323_p2, %p322_p1 }
   0xb   : > { %p329_p5 = scmp.eq.s32.totalorder %s995_s24, 1  ;;  %s307_s28 = ssub.s32 %s1170_s21, %s1465_s25 }
   0xc   : > { %p998_p6 = scmp.ge.s32.totalorder %s1174_s22, 1  ;;  %p310_p7 = scmp.eq.s32.totalorder %s307_s28, 0 }
   0xd   : > { %p1287_p8 = por %p329_p5, %p328_p3  ;;  %p412_p9 = scmp.lt.s32.totalorder %s1174_s22, 3 }
   0xe   : > { %s1293_s30 = scalar_select %p310_p7, %s1162_s19, %s312_s26  }
   0xf   : > { %s1451_s29 = scalar_select %p1287_p8, 1, 0 }
  0x10   : > { %1453 = sst [smem:[#allocation10_spill]] %s1293_s30  ;;  %p413_p10 = pnand %p998_p6, %p412_p9 }
  0x11   : > { %1452 = sst [smem:[#allocation9_spill]] %s1451_s29  ;;  %p479_p11 = scmp.lt.s32.totalorder (!%p413_p10), %s1166_s20, 1 }
  0x12   : > { %416 = sbr.rel (%p413_p10) target bundleno = 686 (0x2ae), region = 64  ;;  %s476_s29 = sand.u32 (!%p413_p10), 1, %s1158_s18  }
  0x17   : > { %v1176_v0 = vmov 0   ;;  %s480_s12 = scalar_select %p479_p11, %s1166_s20, 1  ;;  %vm520_vm0 = vcmask 1042432   ;;  %vm516_vm1 = vcmask 23552   ;;  %v762_v4 = vld [vmem:[%s1437_s8 + $0x18] sm:$0xff]  ;;  %v794_v5 = vld [vmem:[%s1439_s10 + $0x8] sm:$0xff]  ;;  %v556_v12 = vlaneseq }
  0x18   : > { %1088 = vset.pattern.permute.xlu0 %v1176_v0  ;;  %1089 = vset.pattern.permute.xlu1 %v1176_v0  ;;  %vm563_vm2 = vcmask 130048   ;;  %v1177_v50 = vmov 0.0   ;;  %vm644_vm14 = vcmask 64512   ;;  %v793_v26 = vld [vmem:[%s1439_s10] sm:$0xff]  ;;  %vm805_vm15 = vcmask 261120  }
  0x19   : > { %1090 = vset.pattern.permute.xlu2 %v1176_v0  ;;  %s1002_s13 = sshll.u32 %s480_s12, 2  ;;  %s1297_s14 = sshll.u32 %s480_s12, 3  ;;  %v557_v14 = vshrl.u32 %v556_v12, 7 }
  0x1a   : > { %s493_s23 = scalar_lea.vmem %s1431_s2, %s1002_s13  ;;  %s486_s28 = scalar_lea.vmem %s1430_s1, %s1297_s14 }
  0x1b   : > { %v513_v1 = vld [vmem:[%s493_s23] sm:$0x7]  ;;  %s482_s30 = scalar_lea.vmem %s1429_s0, %s1297_s14  ;;  %s499_s17 = scalar_lea.vmem %s1432_s3, %s480_s12 }
  0x1c   : > { %v512_v2 = vld [vmem:[%s486_s28] sm:$0xff]  ;;  %1005 = vmatpush.msk.msra.mxu0 %vm520_vm0, %v513_v1  ;;  %s503_s21 = scalar_lea.vmem %s1433_s4, %s1297_s14  ;;  %s1026_s12 = sshll.u32 %s1166_s20, 4 }
  0x1d   : > { %546 = vperm.xlu0 %1088, %v512_v2   ;;  %v511_v3 = vld [vmem:[%s482_s30] sm:$0xff]  ;;  %s510_s30 = scalar_lea.vmem %s1434_s5, %s1297_s14  ;;  %s852_s13 = scalar_lea.hbm %s1440_s11, %s1026_s12 }
  0x1e   : > { %1006 = vmatmul.msk.f32.vlgmr.msra.gmra.mxu0 %vm516_vm1, %v511_v3  ;;  %v1091_v6 = vld [vmem:[%s499_s17] ss:$0 sm:$0xff]  ;;  %s855_s14 = sshll.u32 %s852_s13, 4  ;;  %s840_s20 = scalar_lea.sflag [#allocation3], %s476_s29  ;;  %s856_s14 = int_to_ptr.hbm [resolvable:$true] %s855_s14 }
  0x1f   : > { %s1110_s16 = sshra.s32 %s856_s14, 4  ;;  %s1111_s16 = int_to_ptr.hbm [resolvable:$true] %s1110_s16 }
  0x20   : > { %s1112_s23 = scalar_lea.hbm %s1111_s16, 16  ;;  %p1117_p1 = scmp.lt.s32.totalorder %s1111_s16, %s1440_s11 }
  0x21   : > { %p1113_p12 = scmp.ne.s32.totalorder %s1111_s16, %s1112_s23 }
  0x23   : > { %p1114_p13 = pnand %p1113_p12, %p1280_p4 }
  0x25   : > { %780 = vperm.xlu0 %1088, %v762_v4   ;;  %p1115_p0 = pneg %p1114_p13 }
  0x2d   : > { %802 = vperm.xlu0 %1088, %v794_v5  }
  0x8f   : > { %v547_v7 = vpop.permute.xlu0 %546 }
  0x90   : > { %v552_v8 = vadd.f32 %v1091_v6, %v547_v7 }
  0x9b   : > { %v541_v9 = vpop.f32.mrf.mxu0 }
  0x9c   : > { %v553_v10 = vmul.f32 2.0, %v541_v9 }
  0x9e   : > { %v554_v11 = vsub.f32 %v552_v8, %v553_v10 }
  0xa0   : > { %v555_v13 = vmax.f32 %v554_v11, 0.0 }
  0xa2   : > { %v558_v15 = vand.u32 2147483647, %v555_v13  ;;  %v605_v30 = vmax.f32 %v555_v13, 1e-10 }
  0xa4   : > { %v560_v16 = vand.u32 4294967288, %v558_v15  ;;  %1092 = vrcp.f32 %v605_v30  ;;  %v617_v52 = vand.u32 2147483648, %v605_v30  ;;  %vm611_vm6 = vweird.f32 %v605_v30 }
  0xa5   : > { %v615_v54 = vand.u32 2147483647, %v605_v30 }
  0xa6   : > { %v561_v17 = vor.u32 %v560_v16, %v557_v14  ;;  %v618_v59 = vor.u32 1.1754944e-38, %v617_v52 }
  0xa7   : > { %vm616_vm9 = vcmp.eq.f32.partialorder %v615_v54, 8.507059e+37 }
  0xa8   : > { %v564_v18 = vsel %vm563_vm2, %v561_v17, inf }
  0xa9   : > { %v565_v19 = vrot.slane %v564_v18, 4 }
  0xaa   : > { %v1093_v36 = vpop.eup %1092 }
  0xab   : > { %v566_v20 = vmin.f32 %v564_v18, %v565_v19  ;;  %v607_v39 = vmul.f32 %v1093_v36, %v605_v30  ;;  %vm612_vm5 = vweird.f32 %v1093_v36  ;;  %v676_v18 = vld [vmem:[%s510_s30] sm:$0xff]  ;;  %v673_v19 = vld [vmem:[%s1436_s7 + $0x8] sm:$0xff]  ;;  %v670_v30 = vld [vmem:[%s1435_s6 + $0x10] sm:$0xff]  ;;  %s999_s30 = sshll.u32 %s476_s29, 4 }
  0xac   : > { %vm613_vm7 = vmor %vm611_vm6, %vm612_vm5  ;;  %1027 = vmatpush.msra.mxu2 %v676_v18  ;;  %s478_s24 = scalar_lea.vmem [#allocation2], %s999_s30 }
  0xad   : > { %v567_v21 = vrot.slane %v566_v20, 2  ;;  %v608_v43 = vsub.f32 1.0, %v607_v39  ;;  %1012 = vmatmul.msk.f32.vlgmr.msra.gmra.mxu2 %vm644_vm14, %v673_v19  ;;  %s853_s15 = sshll.u32 %s478_s24, 4  ;;  %s854_s15 = int_to_ptr.vmem [resolvable:$true] %s853_s15 }
  0xaf   : > { %v568_v22 = vmin.f32 %v566_v20, %v567_v21  ;;  %v609_v46 = vmul.f32 %v1093_v36, %v608_v43  ;;  %v674_v20 = vld [vmem:[%s1436_s7 + $0x10] sm:$0xff] }
  0xb0   : > { %v761_v21 = vld [vmem:[%s1437_s8 + $0x10] sm:$0xff] }
  0xb1   : > { %v569_v23 = vrot.slane %v568_v22, 1  ;;  %v610_v49 = vadd.f32 %v1093_v36, %v609_v46  ;;  %775 = vperm.xlu1 %1089, %v761_v21  }
  0xb3   : > { %v570_v24 = vmin.f32 %v568_v22, %v569_v23  ;;  %v614_v57 = vsel %vm613_vm7, %v1093_v36, %v610_v49  ;;  %v672_v22 = vld [vmem:[%s1436_s7] sm:$0xff]  ;;  %v675_v23 = vld [vmem:[%s1436_s7 + $0x18] sm:$0xff] }
  0xb4   : > { %v619_v61 = vsel %vm616_vm9, %v618_v59, %v614_v57  ;;  %v792_v57 = vld [vmem:[%s1438_s9 + $0x8] sm:$0xff] }
  0xb5   : > { %v572_v25 = vand.u32 7, %v570_v24  ;;  %1013 = vmatmul.msk.f32.gmra.mxu2 %vm644_vm14, %v674_v20  ;;  %v760_v24 = vld [vmem:[%s1437_s8 + $0x8] sm:$0xff] }
  0xb7   : > { %vm1320_vm3 = vcmp.eq.s32.totalorder %v557_v14, %v572_v25  ;;  %v759_v25 = vld [vmem:[%s1437_s8] sm:$0xff] }
  0xb8   : > { %v577_v27 = vsel %vm1320_vm3, inf, %v561_v17  ;;  %v1007_v55 = vsel %vm1320_vm3, 1.0, %v1177_v50  ;;  %v515_v17 = vld [vmem:[%s503_s21] sm:$0xff]  ;;  %765 = vperm.xlu2 %1090, %v759_v25   ;;  %s1116_s21 = scalar_lea.hbm %s1440_s11, 32 }
  0xb9   : > { %v578_v28 = vsel %vm563_vm2, %v577_v27, inf  ;;  %770 = vperm.xlu1 %1089, %v760_v24   ;;  %p1118_p2 = scmp.lt.s32.totalorder %s1116_s21, %s1112_s23 }
  0xba   : > { %v579_v29 = vrot.slane %v578_v28, 4 }
  0xbb   : > { %p1119_p3 = por %p1118_p2, %p1117_p1 }
  0xbc   : > { %v580_v31 = vmin.f32 %v578_v28, %v579_v29  ;;  %v668_v28 = vld [vmem:[%s1435_s6] sm:$0xff] }
  0xbd   : > { %1014 = vmatmul.msk.f32.gmra.mxu2 %vm644_vm14, %v675_v23  ;;  %p1120_p5 = pnand %p1119_p3, %p1115_p0 }
  0xbe   : > { %v581_v32 = vrot.slane %v580_v31, 2 }
  0xc0   : > { %v582_v33 = vmin.f32 %v580_v31, %v581_v32  ;;  %797 = vperm.xlu2 %1090, %v793_v26   ;;  %v671_v31 = vld [vmem:[%s1435_s6 + $0x18] sm:$0xff] }
  0xc2   : > { %v583_v34 = vrot.slane %v582_v33, 1 }
  0xc4   : > { %v584_v35 = vmin.f32 %v582_v33, %v583_v34 }
  0xc6   : > { %v586_v37 = vand.u32 7, %v584_v35 }
  0xc8   : > { %vm587_vm4 = vcmp.eq.s32.totalorder %v557_v14, %v586_v37 }
  0xc9   : > { %v591_v38 = vsel %vm587_vm4, inf, %v577_v27  ;;  %v1008_v51 = vsel %vm587_vm4, 1.0, %v1177_v50  ;;  %v669_v27 = vld [vmem:[%s1435_s6 + $0x8] sm:$0xff] }
  0xca   : > { %v592_v40 = vsel %vm563_vm2, %v591_v38, inf  ;;  %v590_v56 = vadd.f32 %v1008_v51, %v1007_v55 }
  0xcb   : > { %v593_v41 = vrot.slane %v592_v40, 4 }
  0xcd   : > { %v594_v42 = vmin.f32 %v592_v40, %v593_v41 }
  0xcf   : > { %v595_v44 = vrot.slane %v594_v42, 2 }
  0xd1   : > { %v596_v45 = vmin.f32 %v594_v42, %v595_v44  ;;  %v781_v44 = vpop.permute.xlu0 %780 }
  0xd3   : > { %v597_v47 = vrot.slane %v596_v45, 1 }
  0xd5   : > { %v598_v48 = vmin.f32 %v596_v45, %v597_v47 }
  0xd7   : > { %v600_v53 = vand.u32 7, %v598_v48 }
  0xd9   : > { %vm601_vm8 = vcmp.eq.s32.totalorder %v557_v14, %v600_v53 }
  0xda   : > { %v1009_v58 = vsel %vm601_vm8, 1.0, %v1177_v50 }
  0xdb   : > { %v604_v60 = vadd.f32 %v1009_v58, %v590_v56  ;;  %v791_v56 = vld [vmem:[%s1438_s9] sm:$0xff] }
  0xdd   : > { %v621_v62 = vmul.f32 %v619_v61, %v604_v60 }
  0xdf   : > { %v622_v63 = vsel %vm563_vm2, %v621_v62, 0.0 }
  0xe0   : > { %v623_v0 = vrot.slane %v622_v63, 4 }
  0xe2   : > { %v624_v1 = vadd.f32 %v623_v0, %v622_v63 }
  0xe4   : > { %v625_v2 = vrot.slane %v624_v1, 2 }
  0xe6   : > { %v626_v3 = vadd.f32 %v625_v2, %v624_v1 }
  0xe8   : > { %v627_v4 = vrot.slane %v626_v3, 1 }
  0xea   : > { %v628_v5 = vadd.f32 %v627_v4, %v626_v3 }
  0xec   : > { %1094 = vrcp.f32 %v628_v5  ;;  %v640_v9 = vand.u32 2147483648, %v628_v5  ;;  %v638_v11 = vand.u32 2147483647, %v628_v5  ;;  %vm634_vm11 = vweird.f32 %v628_v5 }
  0xee   : > { %v641_v13 = vor.u32 1.1754944e-38, %v640_v9  ;;  %vm639_vm13 = vcmp.eq.f32.partialorder %v638_v11, 8.507059e+37 }
  0xf2   : > { %v1095_v6 = vpop.eup %1094 }
  0xf3   : > { %v630_v7 = vmul.f32 %v1095_v6, %v628_v5  ;;  %vm635_vm10 = vweird.f32 %v1095_v6 }
  0xf4   : > { %vm636_vm12 = vmor %vm634_vm11, %vm635_vm10 }
  0xf5   : > { %v631_v8 = vsub.f32 1.0, %v630_v7 }
  0xf7   : > { %v632_v10 = vmul.f32 %v1095_v6, %v631_v8 }
  0xf9   : > { %v633_v12 = vadd.f32 %v1095_v6, %v632_v10 }
  0xfb   : > { %v637_v14 = vsel %vm636_vm12, %v1095_v6, %v633_v12 }
  0xfc   : > { %v642_v15 = vsel %vm639_vm13, %v641_v13, %v637_v14 }
  0xfd   : > { %v643_v16 = vmul.f32 %v642_v15, %v621_v62  ;;  %v803_v62 = vpop.permute.xlu0 %802 }
  0xff   : > { %663 = vmatpush.msra.mxu1 %v643_v16 }
 0x100   : > { %1010 = vmatmul.msk.f32.vlgmr.msra.gmra.mxu1 %vm644_vm14, %v515_v17 }
 0x101   : > { %704 = vmatpush.msrb.mxu1 %v676_v18 }
 0x108   : > { %1011 = vmatmul.msk.f32.vlgmr.msrb.gmra.mxu1 %vm644_vm14, %v672_v22 }
 0x112   : > { %v766_v49 = vpop.permute.xlu2 %765 }
 0x11a   : > { %v798_v58 = vpop.permute.xlu2 %797 }
 0x123   : > { %v776_v36 = vpop.permute.xlu1 %775 }
 0x12b   : > { %v771_v45 = vpop.permute.xlu1 %770 }
 0x130   : > { %v709_v32 = vpop.f32.mrf.mxu2 }
 0x138   : > { %v712_v34 = vpop.f32.mrf.mxu2 }
 0x140   : > { %v715_v38 = vpop.f32.mrf.mxu2 }
 0x17d   : > { %v665_v29 = vpop.f32.mrf.mxu1 }
 0x17e   : > { %745 = vmatpush.msra.mxu1 %v665_v29  ;;  %1028 = vmatpush.msra.mxu3 %v665_v29 }
 0x17f   : > { %1016 = vmatmul.msk.f32.vlgmr.msra.gmra.mxu3 %vm644_vm14, %v669_v27  ;;  %1015 = vmatmul.msk.f32.vlgmr.msra.gmra.mxu1 %vm644_vm14, %v668_v28 }
 0x185   : > { %v706_v35 = vpop.f32.mrf.mxu1 }
 0x187   : > { %1017 = vmatmul.msk.f32.gmra.mxu3 %vm644_vm14, %v670_v30 }
 0x18f   : > { %1018 = vmatmul.msk.f32.gmra.mxu3 %vm644_vm14, %v671_v31 }
 0x1fc   : > { %v747_v40 = vpop.f32.mrf.mxu1 }
 0x1fd   : > { %v748_v46 = vadd.f32 %v747_v40, %v706_v35 }
 0x1ff   : > { %v783_v52 = vadd.f32 %v766_v49, %v748_v46 }
 0x201   : > { %v787_v55 = vmax.f32 %v783_v52, 0.0 }
 0x202   : > { %v750_v33 = vpop.f32.mrf.mxu3 }
 0x203   : > { %v751_v42 = vadd.f32 %v750_v33, %v709_v32 }
 0x205   : > { %v784_v50 = vadd.f32 %v771_v45, %v751_v42 }
 0x207   : > { %v788_v54 = vmax.f32 %v784_v50, 0.0 }
 0x20a   : > { %v753_v37 = vpop.f32.mrf.mxu3 }
 0x20b   : > { %v754_v39 = vadd.f32 %v753_v37, %v712_v34 }
 0x20d   : > { %v785_v48 = vadd.f32 %v776_v36, %v754_v39 }
 0x20f   : > { %v789_v53 = vmax.f32 %v785_v48, 0.0 }
 0x212   : > { %v756_v41 = vpop.f32.mrf.mxu3 }
 0x213   : > { %v757_v43 = vadd.f32 %v756_v41, %v715_v38 }
 0x215   : > { %v786_v47 = vadd.f32 %v781_v44, %v757_v43 }
 0x217   : > { %v790_v51 = vmax.f32 %v786_v47, 0.0 }
 0x219   : > { %824 = vmatpush.msrb.mxu0 %v790_v51 }
 0x21b   : > { %825 = vmatpush.msrb.mxu0 %v789_v53 }
 0x21d   : > { %826 = vmatpush.msrb.mxu0 %v788_v54 }
 0x21f   : > { %827 = vmatpush.msrb.mxu0 %v787_v55 }
 0x220   : > { %1019 = vmatmul.msk.f32.vlgmr.msrb.gmra.mxu0 %vm805_vm15, %v791_v56 }
 0x228   : > { %1020 = vmatmul.msk.f32.gmra.mxu0 %vm805_vm15, %v792_v57 }
 0x29d   : > { %v829_v59 = vpop.f32.mrf.mxu0 }
 0x29e   : > { %v830_v60 = vadd.f32 %v829_v59, %v798_v58 }
 0x2a0   : > { %v835_v61 = vmax.f32 %v830_v60, 0.0 }
 0x2a2   : > { %837 = vst.msk [vmem:[%s478_s24] sm:$0xff] %vm563_vm2, %v835_v61 }
 0x2a5   : > { %v832_v63 = vpop.f32.mrf.mxu0 }
 0x2a6   : > { %v833_v0 = vadd.f32 %v832_v63, %v803_v62 }
 0x2a8   : > { %v836_v1 = vmax.f32 %v833_v0, 0.0 }
 0x2aa   : > { %838 = vst.msk [vmem:[%s478_s24 + $0x8] sm:$0xff] %vm563_vm2, %v836_v1 }
 0x2ab   : > { %1123 = shalt.err (!%p1120_p5)
}
 0x2ac   : > { %s1178_s29 = smov 128   ;;  %s1179_s12 = smov 8  }
 0x2ad   : > { %1029 = dma.vmem_to_hbm [thread:$0]  (%p1280_p4), %s854_s15, 256, %s856_s14, %s840_s20, %s1178_s29, %s1178_s29, %s1179_s12  }
 0x2ae PF: > { %s1456_s24 = sld [smem:[#allocation5_spill]]  ;;  %p1035_p6 = scmp.ge.s32.totalorder %s1174_s22, 2 }
 0x2b0   : > { %p1032_p7 = pnand %p1035_p6, %p1287_p8 }
 0x2b2   : > { %p1033_p9 = pneg %p1032_p7 }
 0x2b4   : > { %s870_s28 = sand.u32 1, %s1456_s24  }
 0x2b5   : > { %s871_s13 = scalar_lea.sflag [#allocation3], %s870_s28 }
 0x2b6   : > { %1149 = dma.done.wait (%p1033_p9), %s871_s13, 256  }
 0x2b7   : > { %1151 = vsyncadd (%p1033_p9), %s871_s13, 4294967040  ;;  %s24_s22 = sadd.s32 1, %s1174_s22   ;;  %s1458_s16 = sld [smem:[#allocation6_spill]] }
 0x2b8   : > { %p21_p10 = scmp.ge.s32.totalorder %s24_s22, 4   ;;  %s1459_s19 = sld [smem:[#allocation10_spill]] }
 0x2b9   : > { %s1460_s20 = sld [smem:[#allocation7_spill]]  ;;  %s1462_s17 = smov %s1158_s18 }
 0x2ba   : > { %s1461_s21 = sld [smem:[#allocation8_spill]]  ;;  %23 = sbr.rel (!%p21_p10) target bundleno = 4 (0x4), region = 114 }
 0x2bd   : > { %s1463_s18 = smov %s1458_s16 }
 0x2bf   :  { %877 = vsyncpa [#allocation3], 1 }
 0x2c0   :  { %879 = vsyncpa [#allocation3 + $0x1], 1 }

</bundles_post_ra>
